<compile_context>
chip_gen: v7x
topology: tpu7x:2x2x1
jax: 0.10.0
libtpu: 0.0.40
codegen_flags: <defaults>
</compile_context>

<pallas_src>
import math

import jax
import jax.numpy as jnp
from jax import lax
from jax.experimental import pallas as pl
from jax.experimental.pallas import tpu as pltpu

NEG_INF = -1e9


def mha_kernel(q_ref, k_ref, v_ref, bias_ref,
               wq_ref, bq_ref, wk_ref, bk_ref, wv_ref, bv_ref,
               wo_ref, bo_ref,
               weights_ref, out_ref):
    # One (batch, q-tile, head) step.  Shapes seen by the kernel:
    #   q_ref    (1, TQ, D) bf16      k_ref/v_ref (1, S, D) bf16
    #   bias_ref (1, TQ, S) bf16      wq/wk/wv    (1, D, dh) bf16 (pre-transposed)
    #   bq/bk/bv (1, 1, dh) f32       wo_ref      (1, dh, D) bf16
    #   bo_ref   (1, D) f32
    #   weights_ref (1, 1, TQ, S) f32 out_ref     (1, TQ, D) f32 (accumulated over h)
    h = pl.program_id(2)

    q = q_ref[0]                                   # (TQ, D)
    k = k_ref[0]                                   # (S,  D)
    v = v_ref[0]                                   # (S,  D)

    mm = (((1,), (0,)), ((), ()))                  # A(M,K) @ B(K,N)
    mm_t = (((1,), (1,)), ((), ()))                # contract last dims (no explicit .T)

    # Per-head projections; weights already transposed/head-sliced (and Wq,bq
    # pre-scaled by 1/sqrt(d_head)) in the wrapper.
    qh = lax.dot_general(q, wq_ref[0], mm, preferred_element_type=jnp.float32) + bq_ref[0]
    kh = lax.dot_general(k, wk_ref[0], mm, preferred_element_type=jnp.float32) + bk_ref[0]
    vh = lax.dot_general(v, wv_ref[0], mm, preferred_element_type=jnp.float32) + bv_ref[0]

    # logits (TQ, S) + additive mask bias (0 / -1e9), computed once per step.
    logits = lax.dot_general(qh.astype(jnp.bfloat16), kh.astype(jnp.bfloat16),
                             mm_t, preferred_element_type=jnp.float32)
    logits = logits + bias_ref[0].astype(jnp.float32)

    # numerically-stable softmax; reciprocal goes to the EUP slot.
    m = jnp.max(logits, axis=-1, keepdims=True)
    e = jnp.exp(logits - m)
    w = e * pl.reciprocal(jnp.sum(e, axis=-1, keepdims=True), approx=True)   # (TQ, S)

    weights_ref[0, 0] = w.astype(weights_ref.dtype)

    # dropout is identity in eval mode (saved_weights are pre-dropout anyway).
    ctx = lax.dot_general(w.astype(jnp.bfloat16), vh.astype(jnp.bfloat16),
                          mm, preferred_element_type=jnp.float32)            # (TQ, dh)

    # This head's contribution to the output projection, accumulated over h.
    contrib = lax.dot_general(ctx.astype(jnp.bfloat16), wo_ref[0],
                              mm, preferred_element_type=jnp.float32)        # (TQ, D)

    @pl.when(h == 0)
    def _init():
        out_ref[0] = jnp.broadcast_to(bo_ref[...], out_ref.shape[1:]).astype(out_ref.dtype)

    out_ref[0] = out_ref[0] + contrib.astype(out_ref.dtype)


def multi_headed_attention(q, k, v, mask, params, n_heads, *, tq=None):
    B, S, D = q.shape
    assert D % n_heads == 0
    dh = D // n_heads
    wq, bq, wk, bk, wv, bv, wo, bo = params

    # q-row tiling: keep the full row block when it comfortably fits VMEM,
    # otherwise tile.  (When n_qt > 1 the per-head K/V projection is recomputed
    # per q-tile; acceptable trade-off for keeping the out-projection reduction
    # on the innermost head axis.)
    if tq is None:
        tq = S if S <= 1024 else 256
    assert S % tq == 0
    n_qt = S // tq

    scale = 1.0 / math.sqrt(dh)

    # ---- free layout plumbing, done once in the wrapper ----
    def head_major_in(w):  # (D_out, D_in) -> (H, D_in, dh) so that y_h = x @ w_h
        return jnp.transpose(w.reshape(n_heads, dh, D), (0, 2, 1))

    wq_h = head_major_in(wq * scale).astype(jnp.bfloat16)       # scale folded into Wq
    wk_h = head_major_in(wk).astype(jnp.bfloat16)
    wv_h = head_major_in(wv).astype(jnp.bfloat16)
    wo_h = wo.T.reshape(n_heads, dh, D).astype(jnp.bfloat16)    # out = sum_h ctx_h @ wo_h

    bq_h = (bq * scale).reshape(n_heads, 1, dh).astype(jnp.float32)
    bk_h = bk.reshape(n_heads, 1, dh).astype(jnp.float32)
    bv_h = bv.reshape(n_heads, 1, dh).astype(jnp.float32)
    bo_r = bo.reshape(1, D).astype(jnp.float32)

    q_bf = q.astype(jnp.bfloat16)
    k_bf = k.astype(jnp.bfloat16)
    v_bf = v.astype(jnp.bfloat16)

    # additive bf16 mask bias: hoists the compare out of the kernel and halves/
    # quarters the per-step S*S HBM read vs an int32 mask.
    mask_bias = jnp.where(mask == 0, NEG_INF, 0.0).astype(jnp.bfloat16)

    grid = (B, n_qt, n_heads)

    in_specs = [
        pl.BlockSpec((1, tq, D), lambda b, qi, h: (b, qi, 0)),     # q
        pl.BlockSpec((1, S, D), lambda b, qi, h: (b, 0, 0)),       # k
        pl.BlockSpec((1, S, D), lambda b, qi, h: (b, 0, 0)),       # v
        pl.BlockSpec((1, tq, S), lambda b, qi, h: (b, qi, 0)),     # mask bias
        pl.BlockSpec((1, D, dh), lambda b, qi, h: (h, 0, 0)),      # Wq (per-head, transposed)
        pl.BlockSpec((1, 1, dh), lambda b, qi, h: (h, 0, 0)),      # bq
        pl.BlockSpec((1, D, dh), lambda b, qi, h: (h, 0, 0)),      # Wk
        pl.BlockSpec((1, 1, dh), lambda b, qi, h: (h, 0, 0)),      # bk
        pl.BlockSpec((1, D, dh), lambda b, qi, h: (h, 0, 0)),      # Wv
        pl.BlockSpec((1, 1, dh), lambda b, qi, h: (h, 0, 0)),      # bv
        pl.BlockSpec((1, dh, D), lambda b, qi, h: (h, 0, 0)),      # Wo (per-head rows)
        pl.BlockSpec((1, D), lambda b, qi, h: (0, 0)),             # bo
    ]
    out_specs = (
        pl.BlockSpec((1, 1, tq, S), lambda b, qi, h: (b, h, qi, 0)),   # attention weights
        pl.BlockSpec((1, tq, D), lambda b, qi, h: (b, qi, 0)),         # output (acc over h)
    )

    weights, out = pl.pallas_call(
        mha_kernel,
        out_shape=(jax.ShapeDtypeStruct((B, n_heads, S, S), jnp.float32),
                   jax.ShapeDtypeStruct((B, S, D), jnp.float32)),
        grid=grid,
        in_specs=in_specs,
        out_specs=out_specs,
        compiler_params=pltpu.CompilerParams(
            dimension_semantics=("parallel", "parallel", "arbitrary")),
    )(q_bf, k_bf, v_bf, mask_bias,
      wq_h, bq_h, wk_h, bk_h, wv_h, bv_h, wo_h, bo_r)
    return weights, out


def reference_forward(q, k, v, mask, params, n_heads):
    B, S, D = q.shape
    dh = D // n_heads
    wq, bq, wk, bk, wv, bv, wo, bo = params

    def proj(x, w, b):
        y = x @ w.T + b
        return y.reshape(B, S, n_heads, dh).transpose(0, 2, 1, 3)   # (B, H, S, dh)

    qp, kp, vp = proj(q, wq, bq), proj(k, wk, bk), proj(v, wv, bv)
    logits = (qp @ kp.transpose(0, 1, 3, 2)) / math.sqrt(dh)
    logits = jnp.where(mask[:, None] == 0, NEG_INF, logits)
    w = jax.nn.softmax(logits, axis=-1)
    ctx = (w @ vp).transpose(0, 2, 1, 3).reshape(B, S, D)
    return w, ctx @ wo.T + bo


def init_params(key, d_model):
    # PyTorch-Linear-style init: U(-1/sqrt(fan_in), 1/sqrt(fan_in)).
    bound = 1.0 / math.sqrt(d_model)
    keys = jax.random.split(key, 8)
    mk_w = lambda k: jax.random.uniform(k, (d_model, d_model), jnp.float32, -bound, bound)
    mk_b = lambda k: jax.random.uniform(k, (d_model,), jnp.float32, -bound, bound)
    return (mk_w(keys[0]), mk_b(keys[1]),
            mk_w(keys[2]), mk_b(keys[3]),
            mk_w(keys[4]), mk_b(keys[5]),
            mk_w(keys[6]), mk_b(keys[7]))


if __name__ == "__main__":
    B, S, D, H = 2, 8, 32, 4   # d_model=32, n_heads=4, d_head=8
    key = jax.random.PRNGKey(0)
    kq, kk, kv, kp = jax.random.split(key, 4)

    q = jax.random.normal(kq, (B, S, D), jnp.float32)
    k = jax.random.normal(kk, (B, S, D), jnp.float32)
    v = jax.random.normal(kv, (B, S, D), jnp.float32)
    # causal-style mask (1 = keep, 0 = masked), broadcast over heads
    mask = jnp.broadcast_to(jnp.tril(jnp.ones((S, S), jnp.int32)), (B, S, S))

    params = init_params(kp, D)

    weights, out = multi_headed_attention(q, k, v, mask, params, H)
    jax.block_until_ready((weights, out))

    # f32 reference; tolerances loosened because MXU operands are bf16
    # (accumulation stays f32) and the softmax reciprocal is approximate.
    w_ref, o_ref = reference_forward(q, k, v, mask, params, H)
    assert jnp.allclose(weights, w_ref, atol=2e-2, rtol=2e-2), \
        float(jnp.max(jnp.abs(weights - w_ref)))
    assert jnp.allclose(out, o_ref, atol=5e-2, rtol=5e-2), \
        float(jnp.max(jnp.abs(out - o_ref)))

    print("KERNEL_OK")
</pallas_src>

<mosaic_0001>
module attributes {stable_mosaic.version = 11 : i64} {
  func.func @mha_kernel(%arg0: i32, %arg1: i32, %arg2: i32, %arg3: memref<1x8x32xbf16, #tpu.memory_space<vmem>>, %arg4: memref<1x8x32xbf16, #tpu.memory_space<vmem>>, %arg5: memref<1x8x32xbf16, #tpu.memory_space<vmem>>, %arg6: memref<1x8x8xbf16, #tpu.memory_space<vmem>>, %arg7: memref<1x32x8xbf16, #tpu.memory_space<vmem>>, %arg8: memref<1x1x8xf32, #tpu.memory_space<vmem>>, %arg9: memref<1x32x8xbf16, #tpu.memory_space<vmem>>, %arg10: memref<1x1x8xf32, #tpu.memory_space<vmem>>, %arg11: memref<1x32x8xbf16, #tpu.memory_space<vmem>>, %arg12: memref<1x1x8xf32, #tpu.memory_space<vmem>>, %arg13: memref<1x8x32xbf16, #tpu.memory_space<vmem>>, %arg14: memref<1x32xf32, #tpu.memory_space<vmem>>, %arg15: memref<1x1x8x8xf32, #tpu.memory_space<vmem>>, %arg16: memref<1x8x32xf32, #tpu.memory_space<vmem>>) attributes {dimension_semantics = [#tpu.dimension_semantics<parallel>, #tpu.dimension_semantics<parallel>, #tpu.dimension_semantics<arbitrary>], iteration_bounds = array<i64: 2, 1, 4>, scalar_prefetch = 0 : i64, scratch_operands = 0 : i64, tpu.core_type = #tpu.core_type<tc>, window_params = [{transform_indices = @transform_0, window_bounds = array<i64: 1, 8, 32>}, {transform_indices = @transform_1, window_bounds = array<i64: 1, 8, 32>}, {transform_indices = @transform_2, window_bounds = array<i64: 1, 8, 32>}, {transform_indices = @transform_3, window_bounds = array<i64: 1, 8, 8>}, {transform_indices = @transform_4, window_bounds = array<i64: 1, 32, 8>}, {transform_indices = @transform_5, window_bounds = array<i64: 1, 1, 8>}, {transform_indices = @transform_6, window_bounds = array<i64: 1, 32, 8>}, {transform_indices = @transform_7, window_bounds = array<i64: 1, 1, 8>}, {transform_indices = @transform_8, window_bounds = array<i64: 1, 32, 8>}, {transform_indices = @transform_9, window_bounds = array<i64: 1, 1, 8>}, {transform_indices = @transform_10, window_bounds = array<i64: 1, 8, 32>}, {pipeline_mode = #tpu.pipeline_mode<synchronous>, transform_indices = @transform_11, window_bounds = array<i64: 1, 32>}, {transform_indices = @transform_12, window_bounds = array<i64: 1, 1, 8, 8>}, {transform_indices = @transform_13, window_bounds = array<i64: 1, 8, 32>}]} {
    %c0 = arith.constant 0 : index
    %c0_0 = arith.constant 0 : index
    %c0_1 = arith.constant 0 : index
    %0 = vector.load %arg3[%c0, %c0_0, %c0_1] : memref<1x8x32xbf16, #tpu.memory_space<vmem>>, vector<1x8x32xbf16>
    %1 = vector.shape_cast %0 : vector<1x8x32xbf16> to vector<8x32xbf16>
    %c0_2 = arith.constant 0 : index
    %c0_3 = arith.constant 0 : index
    %c0_4 = arith.constant 0 : index
    %2 = vector.load %arg4[%c0_2, %c0_3, %c0_4] : memref<1x8x32xbf16, #tpu.memory_space<vmem>>, vector<1x8x32xbf16>
    %3 = vector.shape_cast %2 : vector<1x8x32xbf16> to vector<8x32xbf16>
    %c0_5 = arith.constant 0 : index
    %c0_6 = arith.constant 0 : index
    %c0_7 = arith.constant 0 : index
    %4 = vector.load %arg5[%c0_5, %c0_6, %c0_7] : memref<1x8x32xbf16, #tpu.memory_space<vmem>>, vector<1x8x32xbf16>
    %5 = vector.shape_cast %4 : vector<1x8x32xbf16> to vector<8x32xbf16>
    %c0_8 = arith.constant 0 : index
    %c0_9 = arith.constant 0 : index
    %c0_10 = arith.constant 0 : index
    %6 = vector.load %arg7[%c0_8, %c0_9, %c0_10] : memref<1x32x8xbf16, #tpu.memory_space<vmem>>, vector<1x32x8xbf16>
    %7 = vector.shape_cast %6 : vector<1x32x8xbf16> to vector<32x8xbf16>
    %cst = arith.constant dense<0.000000e+00> : vector<8x8xf32>
    %8 = tpu.matmul %1, %7, %cst {dimension_numbers = #tpu.dot_dimension_numbers<[1], [0], [0], [1], [0, 0, 1, 1], [], []>} : vector<8x32xbf16>, vector<32x8xbf16>, vector<8x8xf32> -> vector<8x8xf32>
    %c0_11 = arith.constant 0 : index
    %c0_12 = arith.constant 0 : index
    %c0_13 = arith.constant 0 : index
    %9 = vector.load %arg8[%c0_11, %c0_12, %c0_13] : memref<1x1x8xf32, #tpu.memory_space<vmem>>, vector<1x1x8xf32>
    %10 = vector.shape_cast %9 : vector<1x1x8xf32> to vector<1x8xf32>
    %11 = vector.broadcast %10 : vector<1x8xf32> to vector<8x8xf32>
    %12 = arith.addf %8, %11 : vector<8x8xf32>
    %c0_14 = arith.constant 0 : index
    %c0_15 = arith.constant 0 : index
    %c0_16 = arith.constant 0 : index
    %13 = vector.load %arg9[%c0_14, %c0_15, %c0_16] : memref<1x32x8xbf16, #tpu.memory_space<vmem>>, vector<1x32x8xbf16>
    %14 = vector.shape_cast %13 : vector<1x32x8xbf16> to vector<32x8xbf16>
    %cst_17 = arith.constant dense<0.000000e+00> : vector<8x8xf32>
    %15 = tpu.matmul %3, %14, %cst_17 {dimension_numbers = #tpu.dot_dimension_numbers<[1], [0], [0], [1], [0, 0, 1, 1], [], []>} : vector<8x32xbf16>, vector<32x8xbf16>, vector<8x8xf32> -> vector<8x8xf32>
    %c0_18 = arith.constant 0 : index
    %c0_19 = arith.constant 0 : index
    %c0_20 = arith.constant 0 : index
    %16 = vector.load %arg10[%c0_18, %c0_19, %c0_20] : memref<1x1x8xf32, #tpu.memory_space<vmem>>, vector<1x1x8xf32>
    %17 = vector.shape_cast %16 : vector<1x1x8xf32> to vector<1x8xf32>
    %18 = vector.broadcast %17 : vector<1x8xf32> to vector<8x8xf32>
    %19 = arith.addf %15, %18 : vector<8x8xf32>
    %c0_21 = arith.constant 0 : index
    %c0_22 = arith.constant 0 : index
    %c0_23 = arith.constant 0 : index
    %20 = vector.load %arg11[%c0_21, %c0_22, %c0_23] : memref<1x32x8xbf16, #tpu.memory_space<vmem>>, vector<1x32x8xbf16>
    %21 = vector.shape_cast %20 : vector<1x32x8xbf16> to vector<32x8xbf16>
    %cst_24 = arith.constant dense<0.000000e+00> : vector<8x8xf32>
    %22 = tpu.matmul %5, %21, %cst_24 {dimension_numbers = #tpu.dot_dimension_numbers<[1], [0], [0], [1], [0, 0, 1, 1], [], []>} : vector<8x32xbf16>, vector<32x8xbf16>, vector<8x8xf32> -> vector<8x8xf32>
    %c0_25 = arith.constant 0 : index
    %c0_26 = arith.constant 0 : index
    %c0_27 = arith.constant 0 : index
    %23 = vector.load %arg12[%c0_25, %c0_26, %c0_27] : memref<1x1x8xf32, #tpu.memory_space<vmem>>, vector<1x1x8xf32>
    %24 = vector.shape_cast %23 : vector<1x1x8xf32> to vector<1x8xf32>
    %25 = vector.broadcast %24 : vector<1x8xf32> to vector<8x8xf32>
    %26 = arith.addf %22, %25 : vector<8x8xf32>
    %27 = arith.truncf %12 : vector<8x8xf32> to vector<8x8xbf16>
    %28 = arith.truncf %19 : vector<8x8xf32> to vector<8x8xbf16>
    %cst_28 = arith.constant dense<0.000000e+00> : vector<8x8xf32>
    %29 = tpu.matmul %27, %28, %cst_28 {dimension_numbers = #tpu.dot_dimension_numbers<[1], [1], [0], [0], [0, 0, 1, 0], [], []>} : vector<8x8xbf16>, vector<8x8xbf16>, vector<8x8xf32> -> vector<8x8xf32>
    %c0_29 = arith.constant 0 : index
    %c0_30 = arith.constant 0 : index
    %c0_31 = arith.constant 0 : index
    %30 = vector.load %arg6[%c0_29, %c0_30, %c0_31] : memref<1x8x8xbf16, #tpu.memory_space<vmem>>, vector<1x8x8xbf16>
    %31 = vector.shape_cast %30 : vector<1x8x8xbf16> to vector<8x8xbf16>
    %32 = arith.extf %31 : vector<8x8xbf16> to vector<8x8xf32>
    %33 = arith.addf %29, %32 : vector<8x8xf32>
    %cst_32 = arith.constant dense<0xFF800000> : vector<8xf32>
    %34 = vector.multi_reduction <maximumf>, %33, %cst_32 [1] : vector<8x8xf32> to vector<8xf32>
    %35 = vector.shape_cast %34 : vector<8xf32> to vector<8x1xf32>
    %36 = vector.broadcast %35 : vector<8x1xf32> to vector<8x8xf32>
    %37 = arith.subf %33, %36 : vector<8x8xf32>
    %38 = math.exp %37 : vector<8x8xf32>
    %cst_33 = arith.constant dense<0.000000e+00> : vector<8xf32>
    %39 = vector.multi_reduction <add>, %38, %cst_33 [1] : vector<8x8xf32> to vector<8xf32>
    %40 = vector.shape_cast %39 : vector<8xf32> to vector<8x1xf32>
    %41 = tpu.reciprocal %40 {approx = true} : vector<8x1xf32> -> vector<8x1xf32>
    %42 = vector.broadcast %41 : vector<8x1xf32> to vector<8x8xf32>
    %43 = arith.mulf %38, %42 : vector<8x8xf32>
    %c0_34 = arith.constant 0 : index
    %c0_35 = arith.constant 0 : index
    %c0_36 = arith.constant 0 : index
    %c0_37 = arith.constant 0 : index
    %44 = vector.load %arg15[%c0_34, %c0_35, %c0_36, %c0_37] : memref<1x1x8x8xf32, #tpu.memory_space<vmem>>, vector<1x1x8x8xf32>
    %45 = vector.shape_cast %44 : vector<1x1x8x8xf32> to vector<8x8xf32>
    %46 = vector.shape_cast %43 : vector<8x8xf32> to vector<1x1x8x8xf32>
    tpu.vector_store %arg15[%c0_34, %c0_35, %c0_36, %c0_37], %46 {strides = array<i32>} : memref<1x1x8x8xf32, #tpu.memory_space<vmem>>, vector<1x1x8x8xf32>,
    %47 = arith.truncf %43 : vector<8x8xf32> to vector<8x8xbf16>
    %48 = arith.truncf %26 : vector<8x8xf32> to vector<8x8xbf16>
    %cst_38 = arith.constant dense<0.000000e+00> : vector<8x8xf32>
    %49 = tpu.matmul %47, %48, %cst_38 {dimension_numbers = #tpu.dot_dimension_numbers<[1], [0], [0], [1], [0, 0, 1, 1], [], []>} : vector<8x8xbf16>, vector<8x8xbf16>, vector<8x8xf32> -> vector<8x8xf32>
    %50 = arith.truncf %49 : vector<8x8xf32> to vector<8x8xbf16>
    %c0_39 = arith.constant 0 : index
    %c0_40 = arith.constant 0 : index
    %c0_41 = arith.constant 0 : index
    %51 = vector.load %arg13[%c0_39, %c0_40, %c0_41] : memref<1x8x32xbf16, #tpu.memory_space<vmem>>, vector<1x8x32xbf16>
    %52 = vector.shape_cast %51 : vector<1x8x32xbf16> to vector<8x32xbf16>
    %cst_42 = arith.constant dense<0.000000e+00> : vector<8x32xf32>
    %53 = tpu.matmul %50, %52, %cst_42 {dimension_numbers = #tpu.dot_dimension_numbers<[1], [0], [0], [1], [0, 0, 1, 1], [], []>} : vector<8x8xbf16>, vector<8x32xbf16>, vector<8x32xf32> -> vector<8x32xf32>
    %c0_i32 = arith.constant 0 : i32
    %54 = arith.cmpi eq, %arg2, %c0_i32 : i32
    %55 = arith.extui %54 : i1 to i32
    %c0_i32_43 = arith.constant 0 : i32
    %56 = arith.cmpi ne, %55, %c0_i32_43 : i32
    scf.if %56 {
      %c0_50 = arith.constant 0 : index
      %c0_51 = arith.constant 0 : index
      %63 = vector.load %arg14[%c0_50, %c0_51] : memref<1x32xf32, #tpu.memory_space<vmem>>, vector<1x32xf32>
      %64 = vector.shape_cast %63 : vector<1x32xf32> to vector<1x32xf32>
      %65 = vector.broadcast %64 : vector<1x32xf32> to vector<8x32xf32>
      %c0_52 = arith.constant 0 : index
      %c0_53 = arith.constant 0 : index
      %c0_54 = arith.constant 0 : index
      %66 = vector.load %arg16[%c0_52, %c0_53, %c0_54] : memref<1x8x32xf32, #tpu.memory_space<vmem>>, vector<1x8x32xf32>
      %67 = vector.shape_cast %66 : vector<1x8x32xf32> to vector<8x32xf32>
      %68 = vector.shape_cast %65 : vector<8x32xf32> to vector<1x8x32xf32>
      tpu.vector_store %arg16[%c0_52, %c0_53, %c0_54], %68 {strides = array<i32>} : memref<1x8x32xf32, #tpu.memory_space<vmem>>, vector<1x8x32xf32>,
    } else {
    }
    %c0_44 = arith.constant 0 : index
    %c0_45 = arith.constant 0 : index
    %c0_46 = arith.constant 0 : index
    %57 = vector.load %arg16[%c0_44, %c0_45, %c0_46] : memref<1x8x32xf32, #tpu.memory_space<vmem>>, vector<1x8x32xf32>
    %58 = vector.shape_cast %57 : vector<1x8x32xf32> to vector<8x32xf32>
    %59 = arith.addf %58, %53 : vector<8x32xf32>
    %c0_47 = arith.constant 0 : index
    %c0_48 = arith.constant 0 : index
    %c0_49 = arith.constant 0 : index
    %60 = vector.load %arg16[%c0_47, %c0_48, %c0_49] : memref<1x8x32xf32, #tpu.memory_space<vmem>>, vector<1x8x32xf32>
    %61 = vector.shape_cast %60 : vector<1x8x32xf32> to vector<8x32xf32>
    %62 = vector.shape_cast %59 : vector<8x32xf32> to vector<1x8x32xf32>
    tpu.vector_store %arg16[%c0_47, %c0_48, %c0_49], %62 {strides = array<i32>} : memref<1x8x32xf32, #tpu.memory_space<vmem>>, vector<1x8x32xf32>,
    return
  }
  func.func @transform_0(%arg0: i32, %arg1: i32, %arg2: i32) -> (i32, i32, i32) {
    %c0_i32 = arith.constant 0 : i32
    %c0_i32_0 = arith.constant 0 : i32
    return %arg0, %arg1, %c0_i32 : i32, i32, i32
  }
  func.func @transform_1(%arg0: i32, %arg1: i32, %arg2: i32) -> (i32, i32, i32) {
    %c0_i32 = arith.constant 0 : i32
    %c0_i32_0 = arith.constant 0 : i32
    %c0_i32_1 = arith.constant 0 : i32
    return %arg0, %c0_i32, %c0_i32_0 : i32, i32, i32
  }
  func.func @transform_2(%arg0: i32, %arg1: i32, %arg2: i32) -> (i32, i32, i32) {
    %c0_i32 = arith.constant 0 : i32
    %c0_i32_0 = arith.constant 0 : i32
    %c0_i32_1 = arith.constant 0 : i32
    return %arg0, %c0_i32, %c0_i32_0 : i32, i32, i32
  }
  func.func @transform_3(%arg0: i32, %arg1: i32, %arg2: i32) -> (i32, i32, i32) {
    %c0_i32 = arith.constant 0 : i32
    %c0_i32_0 = arith.constant 0 : i32
    return %arg0, %arg1, %c0_i32 : i32, i32, i32
  }
  func.func @transform_4(%arg0: i32, %arg1: i32, %arg2: i32) -> (i32, i32, i32) {
    %c0_i32 = arith.constant 0 : i32
    %c0_i32_0 = arith.constant 0 : i32
    %c0_i32_1 = arith.constant 0 : i32
    return %arg2, %c0_i32, %c0_i32_0 : i32, i32, i32
  }
  func.func @transform_5(%arg0: i32, %arg1: i32, %arg2: i32) -> (i32, i32, i32) {
    %c0_i32 = arith.constant 0 : i32
    %c0_i32_0 = arith.constant 0 : i32
    %c0_i32_1 = arith.constant 0 : i32
    return %arg2, %c0_i32, %c0_i32_0 : i32, i32, i32
  }
  func.func @transform_6(%arg0: i32, %arg1: i32, %arg2: i32) -> (i32, i32, i32) {
    %c0_i32 = arith.constant 0 : i32
    %c0_i32_0 = arith.constant 0 : i32
    %c0_i32_1 = arith.constant 0 : i32
    return %arg2, %c0_i32, %c0_i32_0 : i32, i32, i32
  }
  func.func @transform_7(%arg0: i32, %arg1: i32, %arg2: i32) -> (i32, i32, i32) {
    %c0_i32 = arith.constant 0 : i32
    %c0_i32_0 = arith.constant 0 : i32
    %c0_i32_1 = arith.constant 0 : i32
    return %arg2, %c0_i32, %c0_i32_0 : i32, i32, i32
  }
  func.func @transform_8(%arg0: i32, %arg1: i32, %arg2: i32) -> (i32, i32, i32) {
    %c0_i32 = arith.constant 0 : i32
    %c0_i32_0 = arith.constant 0 : i32
    %c0_i32_1 = arith.constant 0 : i32
    return %arg2, %c0_i32, %c0_i32_0 : i32, i32, i32
  }
  func.func @transform_9(%arg0: i32, %arg1: i32, %arg2: i32) -> (i32, i32, i32) {
    %c0_i32 = arith.constant 0 : i32
    %c0_i32_0 = arith.constant 0 : i32
    %c0_i32_1 = arith.constant 0 : i32
    return %arg2, %c0_i32, %c0_i32_0 : i32, i32, i32
  }
  func.func @transform_10(%arg0: i32, %arg1: i32, %arg2: i32) -> (i32, i32, i32) {
    %c0_i32 = arith.constant 0 : i32
    %c0_i32_0 = arith.constant 0 : i32
    %c0_i32_1 = arith.constant 0 : i32
    return %arg2, %c0_i32, %c0_i32_0 : i32, i32, i32
  }
  func.func @transform_11(%arg0: i32, %arg1: i32, %arg2: i32) -> (i32, i32) {
    %c0_i32 = arith.constant 0 : i32
    %c0_i32_0 = arith.constant 0 : i32
    %c0_i32_1 = arith.constant 0 : i32
    return %c0_i32, %c0_i32_0 : i32, i32
  }
  func.func @transform_12(%arg0: i32, %arg1: i32, %arg2: i32) -> (i32, i32, i32, i32) {
    %c0_i32 = arith.constant 0 : i32
    %c0_i32_0 = arith.constant 0 : i32
    return %arg0, %arg2, %arg1, %c0_i32 : i32, i32, i32, i32
  }
  func.func @transform_13(%arg0: i32, %arg1: i32, %arg2: i32) -> (i32, i32, i32) {
    %c0_i32 = arith.constant 0 : i32
    %c0_i32_0 = arith.constant 0 : i32
    return %arg0, %arg1, %c0_i32 : i32, i32, i32
  }
}

</mosaic_0001>

<bundles_post_ra>
// kernel: tpu_custom_call.1
= control target key start
LH: loop header
LB: loop body
LE: loop exit
PB: predicated region body
PF: predicated region fallthrough
CT: control target
= control target key end

     0   :  { %s2058_s0 = inlined_call_operand.vmem [shape: bf16[2,8,32], index: 0, kind: input, shape index: {}]   ;;  %s2059_s1 = inlined_call_operand.vmem [shape: bf16[2,8,32], index: 1, kind: input, shape index: {}]   ;;  %s2060_s2 = inlined_call_operand.vmem [shape: bf16[2,8,32], index: 2, kind: input, shape index: {}]   ;;  %s2061_s3 = inlined_call_operand.vmem [shape: bf16[2,8,8], index: 3, kind: input, shape index: {}]   ;;  %s2062_s4 = inlined_call_operand.vmem [shape: bf16[4,32,8], index: 4, kind: input, shape index: {}]   ;;  %s2063_s5 = inlined_call_operand.vmem [shape: f32[4,1,8], index: 5, kind: input, shape index: {}]   ;;  %s2064_s6 = inlined_call_operand.vmem [shape: bf16[4,32,8], index: 6, kind: input, shape index: {}]   ;;  %s2065_s7 = inlined_call_operand.vmem [shape: f32[4,1,8], index: 7, kind: input, shape index: {}]   ;;  %s2066_s8 = inlined_call_operand.vmem [shape: bf16[4,32,8], index: 8, kind: input, shape index: {}]   ;;  %s2067_s9 = inlined_call_operand.vmem [shape: f32[4,1,8], index: 9, kind: input, shape index: {}]   ;;  %s2068_s10 = inlined_call_operand.vmem [shape: bf16[4,8,32], index: 10, kind: input, shape index: {}]   ;;  %s2069_s11 = inlined_call_operand.vmem [shape: f32[1,32], index: 11, kind: input, shape index: {}]   ;;  %s2070_s12 = inlined_call_operand.hbm [shape: f32[2,4,8,8], index: 12, kind: output, shape index: {0}]   ;;  %s2071_s13 = inlined_call_operand.hbm [shape: f32[2,8,32], index: 13, kind: output, shape index: {1}]  }
   0x1   :  { %2088 = sst [smem:[#allocation20_spill]] %s2058_s0 }
   0x2   :  { %2089 = sst [smem:[#allocation21_spill]] %s2059_s1 }
   0x3   :  { %2090 = sst [smem:[#allocation22_spill]] %s2068_s10 }
   0x4   :  { %2091 = sst [smem:[#allocation23_spill]] %s2069_s11 }
   0x5   :  { %2092 = sst [smem:[#allocation24_spill]] %s2070_s12 }
   0x6   :  { %2093 = sst [smem:[#allocation25_spill]] %s2071_s13 }
   0x7   :  { %19 = vsyncpa [#allocation3], 0 }
   0x8   :  { %21 = vsyncpa [#allocation3 + $0x1], 0 }
   0x9   :  { %22 = vsyncpa [#allocation5], 0 }
   0xa   :  { %24 = vsyncpa [#allocation5 + $0x1], 0  ;;  %s1744_s25 = smov 0   ;;  %s1746_s26 = smov 0  }
   0xb   :  { %s1748_s27 = smov 0   ;;  %s1750_s28 = smov 0  }
   0xc   :  { %s1752_s29 = smov 0   ;;  %s1754_s30 = smov 0  }
   0xd   :  { %2094 = sst [smem:[#allocation8_spill]] %s1754_s30  ;;  %s1756_s14 = smov 0  }
   0xe   :  { %s1758_s15 = smov 0   ;;  %s1760_s16 = smov 0  }
   0xf   :  { %s1762_s17 = smov 0   ;;  %s1764_s18 = smov 0  }
  0x10 LB: > { %s2096_s30 = sld [smem:[#allocation8_spill]]  ;;  %2098 = sst [smem:[#allocation9_spill]] %s1640_s28  ;;  %s1668_s18 = sphi %s1764_s18, %s30_s18   ;;  %s1664_s17 = sphi %s1762_s17, %s2139_s17   ;;  %s1660_s16 = sphi %s1760_s16, %s2138_s16   ;;  %s1656_s15 = sphi %s1758_s15, %s2137_s15   ;;  %s1652_s14 = sphi %s1756_s14, %s2136_s14   ;;  %s1644_s29 = sphi %s1752_s29, %s2134_s29   ;;  %s1640_s28 = sphi %s1750_s28, %s2133_s28   ;;  %s1636_s27 = sphi %s1748_s27, %s2132_s27   ;;  %s1632_s26 = sphi %s1746_s26, %s2141_s26   ;;  %s1628_s25 = sphi %s1744_s25, %s2140_s25  }
  0x11   : > { %2097 = sst [smem:[#allocation8_spill]] %s1636_s27  ;;  %s1304_s19 = sadd.s32 4294967295, %s1668_s18  }
  0x12   : > { %2099 = sst [smem:[#allocation10_spill]] %s1644_s29  ;;  %s1305_s20 = sadd.s32 4294967294, %s1668_s18  }
  0x13   : > { %2101 = sst [smem:[#allocation12_spill]] %s1660_s16  ;;  %s42_s21 = sadd.s32 1, %s1660_s16 }
  0x14   : > { %2102 = sst [smem:[#allocation13_spill]] %s1664_s17  ;;  %s49_s22 = sadd.s32 1, %s1664_s17 }
  0x15   : > { %p43_p0 = scmp.ge.s32.totalorder %s42_s21, 4  ;;  %p1806_p2 = scmp.eq.s32.totalorder %s1304_s19, 7 }
  0x16   : > { %2100 = sst [smem:[#allocation11_spill]] %s2096_s30  ;;  %s371_s23 = sadd.s32 1, %s2096_s30 }
  0x17   : > { %p381_p1 = scmp.ne.s32.totalorder %s2096_s30, %s1644_s29  ;;  %s2144_s21 = smov (%p43_p0, %s42_s21), 0 }
  0x18   : > { %2104 = sst [smem:[#allocation14_spill]] %s2144_s21  ;;  %s2146_s22 = smov (!%p43_p0, %s49_s22), %s1664_s17 }
  0x19   : > { %s365_s13 = ssub.s32 %s1660_s16, %s2144_s21  ;;  %p1817_p3 = por %p1806_p2, %p381_p1 }
  0x1a   : > { %p51_p4 = scmp.ge.s32.totalorder %s2146_s22, 2  ;;  %p387_p5 = scmp.ne.s32.totalorder %s1644_s29, %s1640_s28 }
  0x1b   : > { %s2105_s12 = scalar_select %p1817_p3, 1, 0 }
  0x1c   : > { %p1823_p6 = scmp.eq.s32.totalorder %s1305_s20, 7  ;;  %s399_s11 = sadd.s32 1, %s1636_s27 }
  0x1d   : > { %2106 = sst [smem:[#allocation15_spill]] %s2105_s12  ;;  %s2148_s22 = smov (%p51_p4, %s2146_s22), 0 }
  0x1e   : > { %2108 = sst [smem:[#allocation16_spill]] %s2148_s22  ;;  %p1832_p7 = por %p1823_p6, %p387_p5 }
  0x1f   : > { %p409_p8 = scmp.ne.s32.totalorder %s1636_s27, %s1632_s26  ;;  %s364_s16 = ssub.s32 %s1664_s17, %s2148_s22 }
  0x20   : > { %s2109_s21 = scalar_select %p1832_p7, 1, 0 }
  0x21   : > { %p415_p9 = scmp.ne.s32.totalorder %s1632_s26, %s1628_s25  ;;  %s366_s28 = sor.u32 %s365_s13, %s364_s16 }
  0x22   : > { %p397_p10 = scmp.eq.s32.totalorder %s364_s16, 0  ;;  %p369_p11 = scmp.eq.s32.totalorder %s366_s28, 0 }
  0x23   : > { %p1844_p12 = por %p409_p8, %p1806_p2  ;;  %p1856_p13 = por %p415_p9, %p1823_p6 }
  0x24   : > { %s1849_s12 = scalar_select %p397_p10, %s1636_s27, %s399_s11  }
  0x25   : > { %s1852_s10 = scalar_select %p369_p11, %s2096_s30, %s371_s23  }
  0x26   : > { %2111 = sst [smem:[#allocation17_spill]] %s1849_s12  ;;  %p1308_p0 = scmp.ge.s32.totalorder %s1668_s18, 1 }
  0x27   : > { %2112 = sst [smem:[#allocation18_spill]] %s1852_s10  ;;  %p520_p1 = scmp.lt.s32.totalorder %s1668_s18, 9 }
  0x28   : > { %s2113_s29 = scalar_select %p1856_p13, 1, 0 }
  0x29   : > { %p521_p4 = pnand %p1308_p0, %p520_p1 }
  0x2a   : > { %2114 = sst [smem:[#allocation19_spill]] %s2113_s29  ;;  %p636_p2 = scmp.lt.s32.totalorder (!%p521_p4), %s1652_s14, 3  ;;  %v1670_v0 = vmov (!%p521_p4), 0.0   ;;  %vm1671_vm0 = vmmov (!%p521_p4), 0   ;;  %vm691_vm1 = vcmask (!%p521_p4), 261120   ;;  %vm871_vm2 = vcmask (!%p521_p4), 64512  }
  0x2b   : > { %524 = sbr.rel (%p521_p4) target bundleno = 1296 (0x510), region = 68  ;;  %s2081_s11 = sand.u32 (!%p521_p4), 1, %s1632_s26   ;;  %1372 = vmatprep.subr.bf16.mxu1 (!%p521_p4), %v1670_v0  ;;  %1364 = vmatprep.subr.bf16.mxu0 (!%p521_p4), %v1670_v0  ;;  %vm935_vm3 = vcmask (!%p521_p4), 1043456  }
  0x2c   : > { %s1867_s13 = sshll.u32 (!%p521_p4), %s2081_s11, 3  ;;  %1376 = vmatprep.mubr.msk.bf16.mxu1 (!%p521_p4), %vm1671_vm0, %v1670_v0  ;;  %1368 = vmatprep.mubr.msk.bf16.mxu0 (!%p521_p4), %vm1671_vm0, %v1670_v0  ;;  %p614_p5 = scmp.lt.s32.totalorder (!%p521_p4), %s1656_s15, 1 }
  0x2d   : > { %s2115_s1 = sld [smem:[#allocation21_spill]] (!%p521_p4)  ;;  %s2116_s0 = sld [smem:[#allocation20_spill]] (!%p521_p4) }
  0x2e   : > { %s2118_s24 = sld [smem:[#allocation22_spill]] (!%p521_p4)  ;;  %p1337_p6 = scmp.ne.s32.totalorder (!%p521_p4), %s1652_s14, 0 }
  0x32   : > { %s1871_s28 = scalar_select %p636_p2, %s1652_s14, 3 }
  0x33   : > { %s615_s10 = scalar_select %p614_p5, %s1656_s15, 1 }
  0x34   : > { %s1346_s16 = sshll.u32 %s1871_s28, 4  ;;  %s643_s11 = scalar_lea.vmem %s2063_s5, %s1871_s28 }
  0x35   : > { %s648_s19 = scalar_lea.vmem %s2064_s6, %s1346_s16  ;;  %s640_s17 = scalar_lea.vmem %s2062_s4, %s1346_s16  ;;  %v1322_v12 = vld [vmem:[%s643_s11] ss:$0 sm:$0xff] }
  0x36   : > { %v1508_v1 = vld [vmem:[%s648_s19] sm:$0xff]   ;;  %v1509_v2 = vld [vmem:[%s648_s19 + $0x8] sm:$0xff]   ;;  %s1889_s27 = scalar_lea.vmem %s2066_s8, %s1346_s16  ;;  %s1892_s29 = sshll.u32 %s615_s10, 2 }
  0x37   : > { %1373 = vmatpush3.bf16.msra.mxu1 %v1508_v1  ;;  %v1510_v3 = vld [vmem:[%s640_s17] sm:$0xff]   ;;  %v1511_v4 = vld [vmem:[%s640_s17 + $0x8] sm:$0xff]   ;;  %s624_s23 = scalar_lea.vmem %s2115_s1, %s1892_s29  ;;  %s620_s30 = scalar_lea.vmem %s2116_s0, %s1892_s29 }
  0x38   : > { %1374 = vmatprep.subr.bf16.mxu1 %v1670_v0  ;;  %1365 = vmatpush3.bf16.msra.mxu0 %v1510_v3  ;;  %v666_v5 = vld [vmem:[%s624_s23] sm:$0xf]  ;;  %s651_s16 = scalar_lea.vmem %s2065_s7, %s1871_s28  ;;  %v1513_v23 = vld [vmem:[%s1889_s27 + $0x8] sm:$0xff]   ;;  %s628_s12 = scalar_lea.vmem %s2060_s2, %s1892_s29 }
  0x39   : > { %1366 = vmatprep.subr.bf16.mxu0 %v1670_v0  ;;  %v665_v6 = vld [vmem:[%s620_s30] sm:$0xf]  ;;  %s635_s17 = scalar_lea.vmem %s2061_s3, %s1892_s29  ;;  %s2117_s19 = sld [smem:[#allocation10_spill]] }
  0x3a   : > { %v1326_v7 = vld [vmem:[%s651_s16] ss:$0 sm:$0xff]  ;;  %s659_s16 = scalar_lea.vmem %s2067_s9, %s1871_s28  ;;  %s1321_s22 = sshll.u32 %s1871_s28, 2 }
  0x3b   : > { %1375 = vmatpush3.bf16.msra.mxu1 %v1509_v2  ;;  %v1512_v22 = vld [vmem:[%s1889_s27] sm:$0xff]   ;;  %s1956_s28 = scalar_lea.vmem [#allocation4], %s1867_s13 }
  0x3c   : > { %1388 = vmatprep.subr.bf16.mxu1 %v1670_v0  ;;  %1367 = vmatpush3.bf16.msra.mxu0 %v1511_v4  ;;  %v667_v24 = vld [vmem:[%s628_s12] sm:$0xf]  ;;  %s663_s12 = scalar_lea.vmem %s2118_s24, %s1321_s22 }
  0x3d   : > { %1380 = vmatprep.subr.bf16.mxu0 %v1670_v0  ;;  %v869_v25 = vld [vmem:[%s635_s17] sm:$0xf] }
  0x3e   : > { %1377 = vmatmul.mubr.msk.bf16.vlgmr.msra.gmra.mrb[0].mxu1 %vm691_vm1, %v666_v5  ;;  %v870_v26 = vunpack.c.l.bf16 %v869_v25  ;;  %v1330_v41 = vld [vmem:[%s659_s16] ss:$0 sm:$0xff]  ;;  %s2119_s16 = sld [smem:[#allocation23_spill]] (!%p1337_p6) }
  0x3f   : > { %1390 = vmatprep.mubr.msk.bf16.mxu1 %vm1671_vm0, %v1670_v0  ;;  %1369 = vmatmul.mubr.msk.bf16.vlgmr.msra.gmra.mrb[0].mxu0 %vm691_vm1, %v665_v6  ;;  %v980_v46 = vld [vmem:[%s663_s12] sm:$0xf]  ;;  %s2087_s30 = sand.u32 1, %s2117_s19  }
  0x40   : > { %1384 = vmatprep.mubr.msk.bf16.mxu0 %vm1671_vm0, %v1670_v0  ;;  %1381 = vmatpush3.bf16.msra.mxu0 %v1512_v22  ;;  %v985_v47 = vsel %vm935_vm3, %v980_v46, 0  ;;  %s1309_s10 = sshll.u32 %s2087_s30, 3 }
  0x41   : > { %1382 = vmatprep.subr.bf16.mxu0 %v1670_v0  ;;  %s606_s17 = scalar_lea.vmem [#allocation2], %s1309_s10 }
  0x44   : > { %1383 = vmatpush3.bf16.msra.mxu0 %v1513_v23  ;;  %v1338_v61 = vld [vmem:[%s2119_s16] ss:$0 sm:$0xff] (!%p1337_p6) }
  0x45   : > { %1394 = vmatprep.subr.bf16.mxu0 %v1670_v0  ;;  %1038 = vst.msk [vmem:[%s1956_s28] sm:$0xff] (!%p1337_p6), %vm691_vm1, %v1338_v61 }
  0x47   : > { %1385 = vmatmul.mubr.msk.bf16.vlgmr.msra.gmra.mrb[4].mxu0 %vm691_vm1, %v667_v24 }
  0x48   : > { %1396 = vmatprep.mubr.msk.bf16.mxu0 %vm1671_vm0, %v1670_v0 }
 0x111   : > { %v795_v8 = vpop.f32.mrb[0].mxu1 }
 0x112   : > { %v796_v9 = vadd.f32 %v1326_v7, %v795_v8  ;;  %v1378_v10 = vpop.f32.mrb[1].mxu1  ;;  %v729_v13 = vpop.f32.mrb[0].mxu0 }
 0x113   : > { %v798_v11 = vpop.f32.mrb[2].mxu1  ;;  %v1370_v16 = vpop.f32.mrb[1].mxu0  ;;  %v730_v19 = vadd.f32 %v1322_v12, %v729_v13 }
 0x114   : > { %v868_v14 = vpack.c.bf16 %v796_v9, %v796_v9  ;;  %v1379_v15 = vpop.f32.mrb[3].mxu1  ;;  %v732_v17 = vpop.f32.mrb[2].mxu0 }
 0x115   : > { %v1371_v20 = vpop.f32.mrb[3].mxu0  ;;  %v867_v21 = vpack.c.bf16 %v730_v19, %v730_v19 }
 0x116   : > { %v876_v18 = vsel %vm871_vm2, %v868_v14, 0 }
 0x117   : > { %1389 = vmatpush3.bf16.xpose.msra.mxu1 %v876_v18 }
 0x118   : > { %1400 = vmatprep.subr.bf16.mxu1 %v1670_v0 }
 0x11a   : > { %v861_v38 = vpop.f32.mrb[4].mxu0 }
 0x11b   : > { %v1386_v39 = vpop.f32.mrb[5].mxu0  ;;  %v862_v43 = vadd.f32 %v1330_v41, %v861_v38 }
 0x11c   : > { %v864_v40 = vpop.f32.mrb[6].mxu0 }
 0x11d   : > { %v1387_v42 = vpop.f32.mrb[7].mxu0  ;;  %v931_v44 = vpack.c.bf16 %v862_v43, %v862_v43 }
 0x11e   : > { %1391 = vmatmul.mubr.msk.bf16.vlgmr.msra.gmra.mrb[4].mxu1 %vm871_vm2, %v867_v21 }
 0x11f   : > { %1402 = vmatprep.mubr.msk.bf16.mxu1 %vm1671_vm0, %v1670_v0  ;;  %v937_v45 = vsel %vm935_vm3, %v931_v44, 0  ;;  %1401 = vmatpush3.bf16.msra.mxu1 %v985_v47 }
 0x120   : > { %1395 = vmatpush3.bf16.msra.mxu0 %v937_v45 }
 0x1f1   : > { %v912_v27 = vpop.f32.mrb[4].mxu1 }
 0x1f2   : > { %v913_v28 = vadd.f32 %v912_v27, %v870_v26  ;;  %v1392_v29 = vpop.f32.mrb[5].mxu1 }
 0x1f3   : > { %v915_v30 = vpop.f32.mrb[6].mxu1 }
 0x1f4   : > { %v1393_v31 = vpop.f32.mrb[7].mxu1  ;;  %v918_v32 = vsel %vm871_vm2, %v913_v28, -inf }
 0x1f5   : > { %919 = vmax.xlane.f32.xlu0 %v918_v32 }
 0x282   : > { %v920_v33 = vpop.xlane.xlu0 %919 }
 0x283   : > { %v921_v34 = vsub.f32 %v913_v28, %v920_v33 }
 0x285   : > { %v922_v35 = vmul.f32 1.442695, %v921_v34 }
 0x287   : > { %1514 = vpow2.f32 %v922_v35 }
 0x291   : > { %v1515_v36 = vpop.eup %1514 }
 0x292   : > { %v924_v37 = vsel %vm871_vm2, %v1515_v36, 0.0 }
 0x293   : > { %925 = vadd.xlane.f32.xlu0 %v924_v37 }
 0x320   : > { %v926_v48 = vpop.xlane.xlu0 %925 }
 0x321   : > { %1516 = vrcp.f32 %v926_v48 }
 0x32b   : > { %v1517_v49 = vpop.eup %1516 }
 0x32c   : > { %v928_v50 = vmul.f32 %v1517_v49, %v1515_v36 }
 0x32e   : > { %929 = vst.msk [vmem:[%s606_s17] sm:$0xff] %vm871_vm2, %v928_v50  ;;  %v930_v51 = vpack.c.bf16 %v928_v50, %v928_v50 }
 0x330   : > { %1397 = vmatmul.mubr.msk.bf16.vlgmr.msra.gmra.mrb[8].mxu0 %vm871_vm2, %v930_v51 }
 0x403   : > { %v973_v52 = vpop.f32.mrb[8].mxu0 }
 0x404   : > { %v979_v53 = vpack.c.bf16 %v973_v52, %v973_v52  ;;  %v1398_v54 = vpop.f32.mrb[9].mxu0 }
 0x405   : > { %v976_v55 = vpop.f32.mrb[10].mxu0 }
 0x406   : > { %v1399_v56 = vpop.f32.mrb[11].mxu0  ;;  %1403 = vmatmul.mubr.msk.bf16.vlgmr.msra.gmra.mrb[8].mxu1 %vm871_vm2, %v979_v53 }
 0x4d6   : > { %1030 = sbr.rel (%p1337_p6) target bundleno = 1245 (0x4dd), region = 72 }
 0x4d9   : > { %v1021_v57 = vpop.f32.mrb[8].mxu1 }
 0x4da   : > { %v1404_v58 = vpop.f32.mrb[9].mxu1 }
 0x4db   : > { %v1024_v59 = vpop.f32.mrb[10].mxu1 }
 0x4dc   : > { %v1405_v60 = vpop.f32.mrb[11].mxu1 }
 0x4dd PF: > { %s2120_s19 = sld [smem:[#allocation10_spill]]  ;;  %v1039_v62 = vld [vmem:[%s1956_s28] sm:$0xff]  ;;  %s1341_s13 = sshll.u32 %s1656_s15, 2 }
 0x4de   : > { %v1040_v63 = vadd.f32 %v1039_v62, %v1021_v57  ;;  %s1060_s11 = sadd.s32 %s1652_s14, %s1341_s13  ;;  %s1064_s23 = sshll.u32 %s606_s17, 4  ;;  %s1967_s23 = int_to_ptr.vmem [resolvable:$true] %s1064_s23 }
 0x4df   : > { %s1342_s24 = sshll.u32 %s1060_s11, 7  ;;  %s2122_s27 = sld [smem:[#allocation24_spill]] }
 0x4e0   : > { %1041 = vst.msk [vmem:[%s1956_s28] sm:$0xff] %vm691_vm1, %v1040_v63  ;;  %s1518_s1 = scalar_lea.vmem %s1967_s23, 128  ;;  %s1672_s14 = smov [#allocation2]  }
 0x4e1   : > { %p1519_p8 = scmp.ne.s32.totalorder %s1967_s23, %s1518_s1  ;;  %s1522_s17 = sshll.u32 %s1672_s14, 4  ;;  %s1523_s17 = int_to_ptr.vmem [resolvable:$false] %s1522_s17 }
 0x4e2   : > { %s1524_s13 = scalar_lea.vmem %s1523_s17, 256  ;;  %p1525_p11 = scmp.lt.s32.totalorder %s1967_s23, %s1523_s17 }
 0x4e3   : > { %s2124_s16 = sand.u32 1, %s2120_s19   ;;  %p1520_p9 = pnand %p1519_p8, %p1817_p3 }
 0x4e4   : > { %s1043_s0 = scalar_lea.sflag [#allocation3], %s2124_s16  ;;  %p1526_p0 = scmp.lt.s32.totalorder %s1524_s13, %s1518_s1 }
 0x4e5   : > { %s2123_s30 = smov %s2122_s27  ;;  %s1062_s29 = scalar_lea.hbm %s2122_s27, %s1342_s24 }
 0x4e6   : > { %p1521_p10 = pneg %p1520_p9  ;;  %p1527_p1 = por %p1526_p0, %p1525_p11 }
 0x4e8   : > { %p1528_p4 = pnand %p1527_p1, %p1521_p10 }
 0x4ea   : > { %1531 = shalt.err (!%p1528_p4)
}
 0x4eb   : > { %s1532_s11 = scalar_lea.hbm %s1062_s29, 128  ;;  %s1536_s12 = scalar_lea.hbm %s2123_s30, 1024 }
 0x4ec   : > { %p1533_p2 = scmp.ne.s32.totalorder %s1062_s29, %s1532_s11  ;;  %p1537_p8 = scmp.lt.u32.totalorder %s1062_s29, %s2123_s30 }
 0x4ed   : > { %p1538_p9 = scmp.lt.u32.totalorder %s1536_s12, %s1532_s11  ;;  %p1540_p7 = scmp.lt.u32.totalorder %s1532_s11, %s1062_s29 }
 0x4ee   : > { %p1534_p5 = pnand %p1533_p2, %p1817_p3 }
 0x4ef   : > { %p1539_p13 = por %p1538_p9, %p1537_p8 }
 0x4f0   : > { %p1535_p6 = pneg %p1534_p5 }
 0x4f1   : > { %p1541_p11 = por %p1540_p7, %p1539_p13 }
 0x4f3   : > { %p1542_p10 = pnand %p1541_p11, %p1535_p6 }
 0x4f5   : > { %1545 = shalt.err (!%p1542_p10)
}
 0x4f6   : > { %1406 = dma.vmem_to_hbm [thread:$0]  (%p1817_p3), %s1967_s23, 128, %s1062_s29, %s1043_s0  }
 0x4f7   : > { %s1343_s1 = sshll.u32 %s1656_s15, 7  ;;  %s1078_s16 = sshll.u32 %s1956_s28, 4  ;;  %s1079_s16 = int_to_ptr.vmem [resolvable:$true] %s1078_s16 }
 0x4f8   : > { %s2125_s13 = sld [smem:[#allocation25_spill]]  ;;  %s2126_s11 = sand.u32 1, %s1632_s26  }
 0x4f9   : > { %s1048_s24 = scalar_lea.sflag [#allocation5], %s2126_s11  ;;  %s1546_s12 = scalar_lea.vmem %s1079_s16, 128 }
 0x4fa   : > { %p1547_p7 = scmp.ne.s32.totalorder %s1079_s16, %s1546_s12  ;;  %s1673_s22 = smov [#allocation4]  }
 0x4fb   : > { %s1550_s10 = sshll.u32 %s1673_s22, 4  ;;  %s1551_s10 = int_to_ptr.vmem [resolvable:$false] %s1550_s10 }
 0x4fc   : > { %p1548_p13 = pnand %p1547_p7, %p1844_p12  ;;  %s1552_s27 = scalar_lea.vmem %s1551_s10, 256 }
 0x4fd   : > { %p1553_p3 = scmp.lt.s32.totalorder %s1079_s16, %s1551_s10  ;;  %p1554_p1 = scmp.lt.s32.totalorder %s1552_s27, %s1546_s12 }
 0x4fe   : > { %s1997_s19 = scalar_lea.hbm %s2125_s13, %s1343_s1  ;;  %p1549_p0 = pneg %p1548_p13 }
 0x4ff   : > { %p1555_p4 = por %p1554_p1, %p1553_p3 }
 0x501   : > { %p1556_p2 = pnand %p1555_p4, %p1549_p0 }
 0x503   : > { %1559 = shalt.err (!%p1556_p2)
}
 0x504   : > { %s1560_s0 = scalar_lea.hbm %s1997_s19, 128  ;;  %s1564_s23 = scalar_lea.hbm %s2125_s13, 256 }
 0x505   : > { %p1561_p5 = scmp.ne.s32.totalorder %s1997_s19, %s1560_s0  ;;  %p1565_p9 = scmp.lt.u32.totalorder %s1997_s19, %s2125_s13 }
 0x506   : > { %p1566_p11 = scmp.lt.u32.totalorder %s1564_s23, %s1560_s0  ;;  %p1568_p7 = scmp.lt.u32.totalorder %s1560_s0, %s1997_s19 }
 0x507   : > { %p1562_p6 = pnand %p1561_p5, %p1844_p12 }
 0x508   : > { %p1567_p10 = por %p1566_p11, %p1565_p9 }
 0x509   : > { %p1563_p8 = pneg %p1562_p6 }
 0x50a   : > { %p1569_p13 = por %p1568_p7, %p1567_p10 }
 0x50c   : > { %p1570_p0 = pnand %p1569_p13, %p1563_p8 }
 0x50e   : > { %1573 = shalt.err (!%p1570_p0)
}
 0x50f   : > { %1407 = dma.vmem_to_hbm [thread:$0]  (%p1844_p12), %s1079_s16, 128, %s1997_s19, %s1048_s24  }
 0x510 PF: > { %s2127_s14 = sld [smem:[#allocation9_spill]]  ;;  %p1417_p3 = scmp.ge.s32.totalorder %s1668_s18, 2 }
 0x511   : > { %p2128_p1 = scmp.ne.s32.totalorder %s2109_s21, 0 }
 0x513   : > { %p1411_p4 = pnand %p1417_p3, %p2128_p1 }
 0x516   : > { %s1090_s17 = sand.u32 1, %s2127_s14  }
 0x517   : > { %s1091_s11 = scalar_lea.sflag [#allocation3], %s1090_s17 }
 0x518   : > { %1619 = dma.done.wait (!%p1411_p4), %s1091_s11, 128  }
 0x519   : > { %1621 = vsyncadd (!%p1411_p4), %s1091_s11, 4294967168  ;;  %s2129_s12 = sld [smem:[#allocation19_spill]]  ;;  %s1099_s22 = sand.u32 1, %s1628_s25  }
 0x51a   : > { %s1100_s10 = scalar_lea.sflag [#allocation5], %s1099_s22 }
 0x51f   : > { %p2130_p2 = scmp.ne.s32.totalorder %s2129_s12, 0 }
 0x521   : > { %p1414_p5 = pnand %p1417_p3, %p2130_p2 }
 0x523   : > { %1623 = dma.done.wait (!%p1414_p5), %s1100_s10, 128  }
 0x524   : > { %1625 = vsyncadd (!%p1414_p5), %s1100_s10, 4294967168  ;;  %s30_s18 = sadd.s32 1, %s1668_s18   ;;  %s2131_s20 = sld [smem:[#allocation8_spill]] }
 0x525   : > { %p27_p12 = scmp.ge.s32.totalorder %s30_s18, 10   ;;  %s2132_s27 = sld [smem:[#allocation17_spill]] }
 0x526   : > { %s2133_s28 = sld [smem:[#allocation10_spill]]  ;;  %s2134_s29 = sld [smem:[#allocation11_spill]] }
 0x527   : > { %s2135_s21 = sld [smem:[#allocation18_spill]]  ;;  %s2136_s14 = sld [smem:[#allocation12_spill]] }
 0x528   : > { %s2137_s15 = sld [smem:[#allocation13_spill]]  ;;  %s2138_s16 = sld [smem:[#allocation14_spill]] }
 0x529   : > { %s2139_s17 = sld [smem:[#allocation16_spill]]  ;;  %s2140_s25 = smov %s1632_s26 }
 0x52a   : > { %s2141_s26 = smov %s2131_s20  ;;  %29 = sbr.rel (!%p27_p12) target bundleno = 16 (0x10), region = 154 }
 0x52d   : > { %2142 = sst [smem:[#allocation8_spill]] %s2135_s21 }
 0x531   :  { %1105 = vsyncpa [#allocation3], 1 }
 0x532   :  { %1107 = vsyncpa [#allocation3 + $0x1], 1 }
 0x533   :  { %1108 = vsyncpa [#allocation5], 1 }
 0x534   :  { %1110 = vsyncpa [#allocation5 + $0x1], 1 }

</bundles_post_ra>
